<compile_context>
chip_gen: v6e
topology: v6e:2x2x1
jax: 0.10.0
libtpu: 0.0.40
codegen_flags: <defaults>
</compile_context>

<pallas_src>
import math

import jax
import jax.numpy as jnp
from jax.experimental import pallas as pl
from jax.experimental.pallas import tpu as pltpu

_LANE = 128
_SUBLANE = 8


def _round_up(v, m):
    return ((v + m - 1) // m) * m


# ---------------------------------------------------------------------------
# Path A: degenerate F==1, O==1 net (what the original script instantiates).
# The whole MLP collapses to the elementwise map
#     y = b2 + sum_h w2[h] * relu(w1[h] * x + b1[h])
# so we put the batch on (sublanes, lanes), keep the weights as SMEM scalars,
# and unroll the H loop into VPU fma/max ops.  No XLU traffic, lanes 100% used.
# ---------------------------------------------------------------------------
def _make_elementwise_kernel(n_hidden):
    def kernel(w1_ref, b1_ref, w2_ref, b2_ref, x_ref, o_ref):
        x = x_ref[...]                       # (TR, 128) fp32, batch on lanes+sublanes
        acc = jnp.zeros_like(x)
        for h in range(n_hidden):            # static unroll: ~3 VPU ops per vreg per h
            hid = jnp.maximum(x * w1_ref[h] + b1_ref[h], 0.0)
            acc = acc + hid * w2_ref[h]
        o_ref[...] = acc + b2_ref[0]

    return kernel


# ---------------------------------------------------------------------------
# Path B: general MXU path (any F/H/O).  H and O are zero-padded to 128 once
# in prepare_params (exact through ReLU), so both matmuls are lane-dense and
# the output tile is written with unmasked vector stores.
# ---------------------------------------------------------------------------
def _matmul_kernel(x_ref, w1_ref, b1_ref, w2_ref, b2_ref, o_ref):
    hid = jnp.dot(x_ref[...], w1_ref[...], preferred_element_type=jnp.float32)
    hid = jnp.maximum(hid + b1_ref[...], 0.0)                       # (TN, H_pad)
    y = jnp.dot(hid, w2_ref[...], preferred_element_type=jnp.float32) + b2_ref[...]
    o_ref[...] = y.astype(o_ref.dtype)


def prepare_params(w1, b1, w2, b2):
    """One-time weight layout prep, hoisted out of the per-call hot path.

    w1: (H, F), b1: (H,), w2: (O, H), b2: (O,)  -- PyTorch layouts.
    """
    h, f = w1.shape
    o = w2.shape[0]
    if f == 1 and o == 1:
        return {
            "kind": "elementwise", "f": f, "h": h, "o": o,
            "w1": jnp.asarray(w1, jnp.float32).reshape(h),
            "b1": jnp.asarray(b1, jnp.float32).reshape(h),
            "w2": jnp.asarray(w2, jnp.float32).reshape(h),
            "b2": jnp.asarray(b2, jnp.float32).reshape(1),
        }
    h_pad = _round_up(h, _LANE)
    o_pad = _round_up(o, _LANE)
    return {
        "kind": "matmul", "f": f, "h": h, "o": o, "h_pad": h_pad, "o_pad": o_pad,
        "w1": jnp.pad(jnp.asarray(w1, jnp.float32).T, ((0, 0), (0, h_pad - h))),
        "b1": jnp.pad(jnp.asarray(b1, jnp.float32).reshape(1, h), ((0, 0), (0, h_pad - h))),
        "w2": jnp.pad(jnp.asarray(w2, jnp.float32).T, ((0, h_pad - h), (0, o_pad - o))),
        "b2": jnp.pad(jnp.asarray(b2, jnp.float32).reshape(1, o), ((0, 0), (0, o_pad - o))),
    }


def _forward_elementwise(x, p, block_rows):
    n = x.shape[0]
    h = p["h"]

    rows = pl.cdiv(n, _LANE)                               # 128-lane rows of batch
    tr = min(block_rows, _round_up(rows, _SUBLANE))
    # v7x has 2 TensorCores: once there is enough work, make the ("parallel",)
    # grid have >=2 steps so both cores run; tiny N stays at grid=(1,).
    if rows >= 8 * _SUBLANE and pl.cdiv(rows, tr) < 2:
        tr = _round_up(pl.cdiv(rows, 2), _SUBLANE)
    rows_pad = pl.cdiv(rows, tr) * tr
    total = rows_pad * _LANE

    x_slab = jnp.pad(x.reshape(-1), (0, total - n)).reshape(rows_pad, _LANE)

    smem_spec = pl.BlockSpec(memory_space=pltpu.MemorySpace.SMEM)
    flops = int(4 * n * h)                                 # true work: 2*n*(f*h + h*o)
    bytes_accessed = int(4 * (2 * n + 3 * h + 1))          # x in, y out, tiny weights

    out = pl.pallas_call(
        _make_elementwise_kernel(h),
        out_shape=jax.ShapeDtypeStruct((rows_pad, _LANE), jnp.float32),
        grid=(rows_pad // tr,),
        in_specs=[smem_spec, smem_spec, smem_spec, smem_spec,
                  pl.BlockSpec((tr, _LANE), lambda i: (i, 0))],
        out_specs=pl.BlockSpec((tr, _LANE), lambda i: (i, 0)),
        compiler_params=pltpu.CompilerParams(dimension_semantics=("parallel",)),
        cost_estimate=pl.CostEstimate(flops=flops, transcendentals=0,
                                      bytes_accessed=bytes_accessed),
    )(p["w1"], p["b1"], p["w2"], p["b2"], x_slab)

    return out.reshape(-1)[:n].reshape(n, 1)


def _forward_matmul(x, p, block_n):
    n, f = x.shape
    h, o = p["h"], p["o"]
    o_pad = p["o_pad"]

    # Row tile up to 1024 (multiple of 8); with this cap, n > 1024 already
    # gives a >=2-step "parallel" grid for the v7x megacore.
    tn = min(block_n, _round_up(n, _SUBLANE))
    n_pad = pl.cdiv(n, tn) * tn
    x_p = x if n_pad == n else jnp.pad(x, ((0, n_pad - n), (0, 0)))

    flops = int(2 * n * (f * h + h * o))                   # true (unpadded) work
    bytes_accessed = int(4 * (n * f + f * h + h * (1 + o) + o + n * o))

    out = pl.pallas_call(
        _matmul_kernel,
        out_shape=jax.ShapeDtypeStruct((n_pad, o_pad), jnp.float32),
        grid=(n_pad // tn,),
        in_specs=[
            pl.BlockSpec((tn, f), lambda i: (i, 0)),        # x: tiled over batch
            # Weights/biases: whole-array, resident across the grid (pre-padded
            # once; no in-kernel transpose / relayout).
            pl.BlockSpec(p["w1"].shape, lambda i: (0, 0)),
            pl.BlockSpec(p["b1"].shape, lambda i: (0, 0)),
            pl.BlockSpec(p["w2"].shape, lambda i: (0, 0)),
            pl.BlockSpec(p["b2"].shape, lambda i: (0, 0)),
        ],
        out_specs=pl.BlockSpec((tn, o_pad), lambda i: (i, 0)),   # lane-dense output tile
        compiler_params=pltpu.CompilerParams(dimension_semantics=("parallel",)),
        cost_estimate=pl.CostEstimate(flops=flops, transcendentals=0,
                                      bytes_accessed=bytes_accessed),
    )(x_p, p["w1"], p["b1"], p["w2"], p["b2"])

    return out[:n, :o]


def net_forward(x, params, *, block_rows=1024, block_n=1024):
    """Forward pass of Net: Linear -> ReLU -> Linear.  `params` from prepare_params()."""
    if params["kind"] == "elementwise":
        return _forward_elementwise(x, params, block_rows)
    return _forward_matmul(x, params, block_n)


def init_params(key, n_feature, n_hidden, n_output):
    """Deterministic PyTorch-style init: U(-1/sqrt(fan_in), 1/sqrt(fan_in))."""
    k1, k2, k3, k4 = jax.random.split(key, 4)
    bound1 = 1.0 / math.sqrt(n_feature)
    bound2 = 1.0 / math.sqrt(n_hidden)
    w1 = jax.random.uniform(k1, (n_hidden, n_feature), jnp.float32, -bound1, bound1)
    b1 = jax.random.uniform(k2, (n_hidden,), jnp.float32, -bound1, bound1)
    w2 = jax.random.uniform(k3, (n_output, n_hidden), jnp.float32, -bound2, bound2)
    b2 = jax.random.uniform(k4, (n_output,), jnp.float32, -bound2, bound2)
    return w1, b1, w2, b2


if __name__ == "__main__":
    # Shapes implied by the original script: x = linspace(-1,1,100)[:,None] -> (100, 1),
    # Net(n_feature=1, n_hidden=10, n_output=1).
    N, F_IN, HID, OUT = 100, 1, 10, 1

    key = jax.random.PRNGKey(0)
    w1, b1, w2, b2 = init_params(key, F_IN, HID, OUT)
    params = prepare_params(w1, b1, w2, b2)          # one-time layout prep

    x = jnp.expand_dims(jnp.linspace(-1.0, 1.0, N, dtype=jnp.float32), axis=1)  # (100, 1)

    y = jax.block_until_ready(net_forward(x, params))
    y_ref = jnp.maximum(x @ w1.T + b1, 0.0) @ w2.T + b2
    assert y.shape == (N, OUT)
    assert jnp.allclose(y, y_ref, atol=1e-5, rtol=1e-5)

    # Second call reuses the prepared params / compiled kernel (no per-call weight prep).
    y2 = jax.block_until_ready(net_forward(x * 0.5, params))
    y2_ref = jnp.maximum((x * 0.5) @ w1.T + b1, 0.0) @ w2.T + b2
    assert jnp.allclose(y2, y2_ref, atol=1e-5, rtol=1e-5)

    # Also exercise the general MXU path once (F>1, O>1).
    F2, H2, O2, N2 = 4, 10, 3, 64
    w1b, b1b, w2b, b2b = init_params(jax.random.PRNGKey(1), F2, H2, O2)
    xb = jax.random.normal(jax.random.PRNGKey(2), (N2, F2), jnp.float32)
    pb = prepare_params(w1b, b1b, w2b, b2b)
    yb = jax.block_until_ready(net_forward(xb, pb))
    yb_ref = jnp.maximum(xb @ w1b.T + b1b, 0.0) @ w2b.T + b2b
    assert yb.shape == (N2, O2)
    assert jnp.allclose(yb, yb_ref, atol=1e-5, rtol=1e-5)

    print("KERNEL_OK")
</pallas_src>

<mosaic_0001>
module attributes {stable_mosaic.version = 11 : i64} {
  func.func @kernel(%arg0: i32, %arg1: memref<10xf32, #tpu.memory_space<smem>>, %arg2: memref<10xf32, #tpu.memory_space<smem>>, %arg3: memref<10xf32, #tpu.memory_space<smem>>, %arg4: memref<1xf32, #tpu.memory_space<smem>>, %arg5: memref<8x128xf32, #tpu.memory_space<vmem>>, %arg6: memref<8x128xf32, #tpu.memory_space<vmem>>) attributes {dimension_semantics = [#tpu.dimension_semantics<parallel>], iteration_bounds = array<i64: 1>, scalar_prefetch = 0 : i64, scratch_operands = 0 : i64, tpu.core_type = #tpu.core_type<tc>, window_params = [{transform_indices = @transform_0, window_bounds = array<i64: 10>}, {transform_indices = @transform_1, window_bounds = array<i64: 10>}, {transform_indices = @transform_2, window_bounds = array<i64: 10>}, {transform_indices = @transform_3, window_bounds = array<i64: 1>}, {transform_indices = @transform_4, window_bounds = array<i64: 8, 128>}, {transform_indices = @transform_5, window_bounds = array<i64: 8, 128>}]} {
    %c0 = arith.constant 0 : index
    %c0_0 = arith.constant 0 : index
    %0 = vector.load %arg5[%c0, %c0_0] : memref<8x128xf32, #tpu.memory_space<vmem>>, vector<8x128xf32>
    %cst = arith.constant 0.000000e+00 : f32
    %1 = vector.broadcast %cst : f32 to vector<8x128xf32>
    %c0_1 = arith.constant 0 : index
    %2 = memref.load %arg1[%c0_1] : memref<10xf32, #tpu.memory_space<smem>>
    %3 = vector.broadcast %2 : f32 to vector<8x128xf32>
    %4 = arith.mulf %0, %3 : vector<8x128xf32>
    %c0_2 = arith.constant 0 : index
    %5 = memref.load %arg2[%c0_2] : memref<10xf32, #tpu.memory_space<smem>>
    %6 = vector.broadcast %5 : f32 to vector<8x128xf32>
    %7 = arith.addf %4, %6 : vector<8x128xf32>
    %cst_3 = arith.constant 0.000000e+00 : f32
    %8 = vector.broadcast %cst_3 : f32 to vector<8x128xf32>
    %9 = arith.maximumf %7, %8 : vector<8x128xf32>
    %c0_4 = arith.constant 0 : index
    %10 = memref.load %arg3[%c0_4] : memref<10xf32, #tpu.memory_space<smem>>
    %11 = vector.broadcast %10 : f32 to vector<8x128xf32>
    %12 = arith.mulf %9, %11 : vector<8x128xf32>
    %13 = arith.addf %1, %12 : vector<8x128xf32>
    %c1 = arith.constant 1 : index
    %14 = memref.load %arg1[%c1] : memref<10xf32, #tpu.memory_space<smem>>
    %15 = vector.broadcast %14 : f32 to vector<8x128xf32>
    %16 = arith.mulf %0, %15 : vector<8x128xf32>
    %c1_5 = arith.constant 1 : index
    %17 = memref.load %arg2[%c1_5] : memref<10xf32, #tpu.memory_space<smem>>
    %18 = vector.broadcast %17 : f32 to vector<8x128xf32>
    %19 = arith.addf %16, %18 : vector<8x128xf32>
    %cst_6 = arith.constant 0.000000e+00 : f32
    %20 = vector.broadcast %cst_6 : f32 to vector<8x128xf32>
    %21 = arith.maximumf %19, %20 : vector<8x128xf32>
    %c1_7 = arith.constant 1 : index
    %22 = memref.load %arg3[%c1_7] : memref<10xf32, #tpu.memory_space<smem>>
    %23 = vector.broadcast %22 : f32 to vector<8x128xf32>
    %24 = arith.mulf %21, %23 : vector<8x128xf32>
    %25 = arith.addf %13, %24 : vector<8x128xf32>
    %c2 = arith.constant 2 : index
    %26 = memref.load %arg1[%c2] : memref<10xf32, #tpu.memory_space<smem>>
    %27 = vector.broadcast %26 : f32 to vector<8x128xf32>
    %28 = arith.mulf %0, %27 : vector<8x128xf32>
    %c2_8 = arith.constant 2 : index
    %29 = memref.load %arg2[%c2_8] : memref<10xf32, #tpu.memory_space<smem>>
    %30 = vector.broadcast %29 : f32 to vector<8x128xf32>
    %31 = arith.addf %28, %30 : vector<8x128xf32>
    %cst_9 = arith.constant 0.000000e+00 : f32
    %32 = vector.broadcast %cst_9 : f32 to vector<8x128xf32>
    %33 = arith.maximumf %31, %32 : vector<8x128xf32>
    %c2_10 = arith.constant 2 : index
    %34 = memref.load %arg3[%c2_10] : memref<10xf32, #tpu.memory_space<smem>>
    %35 = vector.broadcast %34 : f32 to vector<8x128xf32>
    %36 = arith.mulf %33, %35 : vector<8x128xf32>
    %37 = arith.addf %25, %36 : vector<8x128xf32>
    %c3 = arith.constant 3 : index
    %38 = memref.load %arg1[%c3] : memref<10xf32, #tpu.memory_space<smem>>
    %39 = vector.broadcast %38 : f32 to vector<8x128xf32>
    %40 = arith.mulf %0, %39 : vector<8x128xf32>
    %c3_11 = arith.constant 3 : index
    %41 = memref.load %arg2[%c3_11] : memref<10xf32, #tpu.memory_space<smem>>
    %42 = vector.broadcast %41 : f32 to vector<8x128xf32>
    %43 = arith.addf %40, %42 : vector<8x128xf32>
    %cst_12 = arith.constant 0.000000e+00 : f32
    %44 = vector.broadcast %cst_12 : f32 to vector<8x128xf32>
    %45 = arith.maximumf %43, %44 : vector<8x128xf32>
    %c3_13 = arith.constant 3 : index
    %46 = memref.load %arg3[%c3_13] : memref<10xf32, #tpu.memory_space<smem>>
    %47 = vector.broadcast %46 : f32 to vector<8x128xf32>
    %48 = arith.mulf %45, %47 : vector<8x128xf32>
    %49 = arith.addf %37, %48 : vector<8x128xf32>
    %c4 = arith.constant 4 : index
    %50 = memref.load %arg1[%c4] : memref<10xf32, #tpu.memory_space<smem>>
    %51 = vector.broadcast %50 : f32 to vector<8x128xf32>
    %52 = arith.mulf %0, %51 : vector<8x128xf32>
    %c4_14 = arith.constant 4 : index
    %53 = memref.load %arg2[%c4_14] : memref<10xf32, #tpu.memory_space<smem>>
    %54 = vector.broadcast %53 : f32 to vector<8x128xf32>
    %55 = arith.addf %52, %54 : vector<8x128xf32>
    %cst_15 = arith.constant 0.000000e+00 : f32
    %56 = vector.broadcast %cst_15 : f32 to vector<8x128xf32>
    %57 = arith.maximumf %55, %56 : vector<8x128xf32>
    %c4_16 = arith.constant 4 : index
    %58 = memref.load %arg3[%c4_16] : memref<10xf32, #tpu.memory_space<smem>>
    %59 = vector.broadcast %58 : f32 to vector<8x128xf32>
    %60 = arith.mulf %57, %59 : vector<8x128xf32>
    %61 = arith.addf %49, %60 : vector<8x128xf32>
    %c5 = arith.constant 5 : index
    %62 = memref.load %arg1[%c5] : memref<10xf32, #tpu.memory_space<smem>>
    %63 = vector.broadcast %62 : f32 to vector<8x128xf32>
    %64 = arith.mulf %0, %63 : vector<8x128xf32>
    %c5_17 = arith.constant 5 : index
    %65 = memref.load %arg2[%c5_17] : memref<10xf32, #tpu.memory_space<smem>>
    %66 = vector.broadcast %65 : f32 to vector<8x128xf32>
    %67 = arith.addf %64, %66 : vector<8x128xf32>
    %cst_18 = arith.constant 0.000000e+00 : f32
    %68 = vector.broadcast %cst_18 : f32 to vector<8x128xf32>
    %69 = arith.maximumf %67, %68 : vector<8x128xf32>
    %c5_19 = arith.constant 5 : index
    %70 = memref.load %arg3[%c5_19] : memref<10xf32, #tpu.memory_space<smem>>
    %71 = vector.broadcast %70 : f32 to vector<8x128xf32>
    %72 = arith.mulf %69, %71 : vector<8x128xf32>
    %73 = arith.addf %61, %72 : vector<8x128xf32>
    %c6 = arith.constant 6 : index
    %74 = memref.load %arg1[%c6] : memref<10xf32, #tpu.memory_space<smem>>
    %75 = vector.broadcast %74 : f32 to vector<8x128xf32>
    %76 = arith.mulf %0, %75 : vector<8x128xf32>
    %c6_20 = arith.constant 6 : index
    %77 = memref.load %arg2[%c6_20] : memref<10xf32, #tpu.memory_space<smem>>
    %78 = vector.broadcast %77 : f32 to vector<8x128xf32>
    %79 = arith.addf %76, %78 : vector<8x128xf32>
    %cst_21 = arith.constant 0.000000e+00 : f32
    %80 = vector.broadcast %cst_21 : f32 to vector<8x128xf32>
    %81 = arith.maximumf %79, %80 : vector<8x128xf32>
    %c6_22 = arith.constant 6 : index
    %82 = memref.load %arg3[%c6_22] : memref<10xf32, #tpu.memory_space<smem>>
    %83 = vector.broadcast %82 : f32 to vector<8x128xf32>
    %84 = arith.mulf %81, %83 : vector<8x128xf32>
    %85 = arith.addf %73, %84 : vector<8x128xf32>
    %c7 = arith.constant 7 : index
    %86 = memref.load %arg1[%c7] : memref<10xf32, #tpu.memory_space<smem>>
    %87 = vector.broadcast %86 : f32 to vector<8x128xf32>
    %88 = arith.mulf %0, %87 : vector<8x128xf32>
    %c7_23 = arith.constant 7 : index
    %89 = memref.load %arg2[%c7_23] : memref<10xf32, #tpu.memory_space<smem>>
    %90 = vector.broadcast %89 : f32 to vector<8x128xf32>
    %91 = arith.addf %88, %90 : vector<8x128xf32>
    %cst_24 = arith.constant 0.000000e+00 : f32
    %92 = vector.broadcast %cst_24 : f32 to vector<8x128xf32>
    %93 = arith.maximumf %91, %92 : vector<8x128xf32>
    %c7_25 = arith.constant 7 : index
    %94 = memref.load %arg3[%c7_25] : memref<10xf32, #tpu.memory_space<smem>>
    %95 = vector.broadcast %94 : f32 to vector<8x128xf32>
    %96 = arith.mulf %93, %95 : vector<8x128xf32>
    %97 = arith.addf %85, %96 : vector<8x128xf32>
    %c8 = arith.constant 8 : index
    %98 = memref.load %arg1[%c8] : memref<10xf32, #tpu.memory_space<smem>>
    %99 = vector.broadcast %98 : f32 to vector<8x128xf32>
    %100 = arith.mulf %0, %99 : vector<8x128xf32>
    %c8_26 = arith.constant 8 : index
    %101 = memref.load %arg2[%c8_26] : memref<10xf32, #tpu.memory_space<smem>>
    %102 = vector.broadcast %101 : f32 to vector<8x128xf32>
    %103 = arith.addf %100, %102 : vector<8x128xf32>
    %cst_27 = arith.constant 0.000000e+00 : f32
    %104 = vector.broadcast %cst_27 : f32 to vector<8x128xf32>
    %105 = arith.maximumf %103, %104 : vector<8x128xf32>
    %c8_28 = arith.constant 8 : index
    %106 = memref.load %arg3[%c8_28] : memref<10xf32, #tpu.memory_space<smem>>
    %107 = vector.broadcast %106 : f32 to vector<8x128xf32>
    %108 = arith.mulf %105, %107 : vector<8x128xf32>
    %109 = arith.addf %97, %108 : vector<8x128xf32>
    %c9 = arith.constant 9 : index
    %110 = memref.load %arg1[%c9] : memref<10xf32, #tpu.memory_space<smem>>
    %111 = vector.broadcast %110 : f32 to vector<8x128xf32>
    %112 = arith.mulf %0, %111 : vector<8x128xf32>
    %c9_29 = arith.constant 9 : index
    %113 = memref.load %arg2[%c9_29] : memref<10xf32, #tpu.memory_space<smem>>
    %114 = vector.broadcast %113 : f32 to vector<8x128xf32>
    %115 = arith.addf %112, %114 : vector<8x128xf32>
    %cst_30 = arith.constant 0.000000e+00 : f32
    %116 = vector.broadcast %cst_30 : f32 to vector<8x128xf32>
    %117 = arith.maximumf %115, %116 : vector<8x128xf32>
    %c9_31 = arith.constant 9 : index
    %118 = memref.load %arg3[%c9_31] : memref<10xf32, #tpu.memory_space<smem>>
    %119 = vector.broadcast %118 : f32 to vector<8x128xf32>
    %120 = arith.mulf %117, %119 : vector<8x128xf32>
    %121 = arith.addf %109, %120 : vector<8x128xf32>
    %c0_32 = arith.constant 0 : index
    %122 = memref.load %arg4[%c0_32] : memref<1xf32, #tpu.memory_space<smem>>
    %123 = vector.broadcast %122 : f32 to vector<8x128xf32>
    %124 = arith.addf %121, %123 : vector<8x128xf32>
    %c0_33 = arith.constant 0 : index
    %c0_34 = arith.constant 0 : index
    %125 = vector.load %arg6[%c0_33, %c0_34] : memref<8x128xf32, #tpu.memory_space<vmem>>, vector<8x128xf32>
    tpu.vector_store %arg6[%c0_33, %c0_34], %124 {strides = array<i32>} : memref<8x128xf32, #tpu.memory_space<vmem>>, vector<8x128xf32>,
    return
  }
  func.func @transform_0(%arg0: i32) -> i32 {
    %c0_i32 = arith.constant 0 : i32
    %c0_i32_0 = arith.constant 0 : i32
    return %c0_i32 : i32
  }
  func.func @transform_1(%arg0: i32) -> i32 {
    %c0_i32 = arith.constant 0 : i32
    %c0_i32_0 = arith.constant 0 : i32
    return %c0_i32 : i32
  }
  func.func @transform_2(%arg0: i32) -> i32 {
    %c0_i32 = arith.constant 0 : i32
    %c0_i32_0 = arith.constant 0 : i32
    return %c0_i32 : i32
  }
  func.func @transform_3(%arg0: i32) -> i32 {
    %c0_i32 = arith.constant 0 : i32
    %c0_i32_0 = arith.constant 0 : i32
    return %c0_i32 : i32
  }
  func.func @transform_4(%arg0: i32) -> (i32, i32) {
    %c0_i32 = arith.constant 0 : i32
    %c0_i32_0 = arith.constant 0 : i32
    return %arg0, %c0_i32 : i32, i32
  }
  func.func @transform_5(%arg0: i32) -> (i32, i32) {
    %c0_i32 = arith.constant 0 : i32
    %c0_i32_0 = arith.constant 0 : i32
    return %arg0, %c0_i32 : i32, i32
  }
}

</mosaic_0001>

<bundles_post_ra>
// kernel: tpu_custom_call.1
= control target key start
LH: loop header
LB: loop body
LE: loop exit
PB: predicated region body
PF: predicated region fallthrough
CT: control target
= control target key end

     0   :  { %11 = vsyncpa [#allocation6], 0  ;;  %s401_s0 = inlined_call_operand.vmem [shape: f32[10], index: 0, kind: input, shape index: {}]   ;;  %s402_s1 = inlined_call_operand.vmem [shape: f32[10], index: 1, kind: input, shape index: {}]   ;;  %s403_s2 = inlined_call_operand.vmem [shape: f32[10], index: 2, kind: input, shape index: {}]   ;;  %s404_s3 = inlined_call_operand.<no memory space> [shape: f32[1], index: 3, kind: input, shape index: {}]   ;;  %s405_s4 = inlined_call_operand.hbm [shape: f32[8,128], index: 4, kind: input, shape index: {}]   ;;  %s406_s5 = inlined_call_operand.hbm [shape: f32[8,128], index: 5, kind: output, shape index: {}]  }
   0x1   :  { %12 = vsyncpa [#allocation8], 0 }
   0x2   :  { %13 = vsyncpa [#allocation4], 0  ;;  %s31_s20 = sshll.u32 %s402_s1, 4  ;;  %s32_s20 = int_to_ptr.vmem [resolvable:$true] %s31_s20 }
   0x3   :  { %14 = vsyncpa [#allocation5], 0  ;;  %s21_s23 = sshll.u32 %s401_s0, 4  ;;  %s234_s24 = scalar_lea.vmem %s32_s20, 16  ;;  %s22_s23 = int_to_ptr.vmem [resolvable:$true] %s21_s23 }
   0x4   :  { %p235_p0 = scmp.ne.s32.totalorder %s32_s20, %s234_s24  ;;  %p239_p1 = scmp.lt.s32.totalorder %s32_s20, %s32_s20 }
   0x5   :  { %p240_p2 = scmp.lt.s32.totalorder %s234_s24, %s234_s24 }
   0x7   :  { %p241_p3 = por %p240_p2, %p239_p1 }
   0x9   :  { %p242_p4 = pnand %p241_p3, %p235_p0 }
   0xb   :  { %245 = shalt.err (!%p242_p4)
}
   0xc   :  { %s318_s25 = smov [#allocation7]   ;;  %s246_s26 = scalar_lea.vmem %s22_s23, 16 }
   0xd   :  { %34 = dma.vmem_to_smem %s32_s20, 16, %s318_s25, [#allocation8]  }
   0xe   :  { %p247_p5 = scmp.ne.s32.totalorder %s22_s23, %s246_s26  ;;  %p251_p6 = scmp.lt.s32.totalorder %s22_s23, %s22_s23 }
   0xf   :  { %p252_p7 = scmp.lt.s32.totalorder %s246_s26, %s246_s26 }
  0x11   :  { %p253_p8 = por %p252_p7, %p251_p6 }
  0x13   :  { %p254_p9 = pnand %p253_p8, %p247_p5 }
  0x15   :  { %257 = shalt.err (!%p254_p9)
}
  0x16   :  { %s319_s1 = smov [#allocation3]   ;;  %s41_s28 = sshll.u32 %s403_s2, 4  ;;  %s42_s28 = int_to_ptr.vmem [resolvable:$true] %s41_s28 }
  0x17   :  { %24 = dma.vmem_to_smem %s22_s23, 16, %s319_s1, [#allocation6]  }
  0x18   :  { %s258_s29 = scalar_lea.vmem %s42_s28, 16  ;;  %p263_p11 = scmp.lt.s32.totalorder %s42_s28, %s42_s28 }
  0x19   :  { %p259_p10 = scmp.ne.s32.totalorder %s42_s28, %s258_s29  ;;  %p264_p12 = scmp.lt.s32.totalorder %s258_s29, %s258_s29 }
  0x1b   :  { %p265_p13 = por %p264_p12, %p263_p11 }
  0x1d   :  { %p266_p0 = pnand %p265_p13, %p259_p10 }
  0x1f   :  { %269 = shalt.err (!%p266_p0)
}
  0x20   :  { %s320_s30 = smov [#allocation9]   ;;  %s321_s6 = smov [#allocation10]  }
  0x21   :  { %44 = dma.vmem_to_smem %s42_s28, 16, %s320_s30, [#allocation8]  }
  0x22   :  { %s53_s7 = sshll.u32 %s321_s6, 4  ;;  %s54_s7 = int_to_ptr.vmem [resolvable:$true] %s53_s7 }
  0x23   :  { %s278_s8 = scalar_lea.vmem %s54_s7, 128  ;;  %p283_p2 = scmp.lt.s32.totalorder %s54_s7, %s54_s7 }
  0x24   :  { %p279_p1 = scmp.ne.s32.totalorder %s54_s7, %s278_s8  ;;  %p284_p3 = scmp.lt.s32.totalorder %s278_s8, %s278_s8 }
  0x26   :  { %p285_p4 = por %p284_p3, %p283_p2 }
  0x28   :  { %p286_p5 = pnand %p285_p4, %p279_p1 }
  0x2a   :  { %289 = shalt.err (!%p286_p5)
}
  0x2b   :  { %56 = dma.hbm_to_vmem [thread:$0]  %s405_s4, 128, %s54_s7, [#allocation4]  }
  0x2c   :  { %310 = dma.done.wait [#allocation6], 16  }
  0x2d   :  { %311 = vsyncadd [#allocation6], 4294967280 }
  0x2e   :  { %312 = dma.done.wait [#allocation8], 32  }
  0x2f   :  { %313 = vsyncadd [#allocation8], 4294967264 }
  0x30   :  { %314 = dma.done.wait [#allocation4], 128  }
  0x31   :  { %315 = vsyncadd [#allocation4], 4294967168 }
  0x32   :  { %69 = sfence }
  0x33   :  { %s71_s10 = sld [smem:[#allocation3]]  ;;  %v365_v0 = vld [vmem:[#allocation10] sm:$0xff] }
  0x34   :  { %s74_s11 = sld [smem:[#allocation7]] }
  0x35   :  { %s78_s12 = sld [smem:[#allocation9]] }
  0x36   :  { %s202_s13 = sld [smem:[#allocation3 + $0x1]] }
  0x37   :  { %s203_s14 = sld [smem:[#allocation7 + $0x1]] }
  0x38   :  { %s204_s15 = sld [smem:[#allocation9 + $0x1]] }
  0x39   :  { %v72_v1 = vstv %s71_s10  ;;  %s205_s16 = sld [smem:[#allocation3 + $0x2]] }
  0x3a   :  { %v73_v2 = vmul.f32 %v72_v1, %v365_v0  ;;  %v75_v3 = vstv %s74_s11  ;;  %s206_s4 = sld [smem:[#allocation7 + $0x2]] }
  0x3b   :  { %s368_s17 = sld [smem:[#allocation9 + $0x2]]  ;;  %v79_v9 = vstv %s78_s12 }
  0x3c   :  { %v76_v4 = vadd.f32 %v75_v3, %v73_v2  ;;  %v83_v5 = vstv %s202_s13  ;;  %s208_s18 = sld [smem:[#allocation3 + $0x3]]  ;;  %s322_s13 = smov [#allocation11]  }
  0x3d   :  { %v84_v6 = vmul.f32 %v83_v5, %v365_v0  ;;  %v86_v7 = vstv %s203_s14  ;;  %s209_s19 = sld [smem:[#allocation7 + $0x3]]  ;;  %s191_s14 = sshll.u32 %s322_s13, 4  ;;  %s192_s14 = int_to_ptr.vmem [resolvable:$true] %s191_s14 }
  0x3e   :  { %v77_v8 = vmax.f32 %v76_v4, 0.0  ;;  %s371_s20 = sld [smem:[#allocation9 + $0x3]]  ;;  %v90_v12 = vstv %s204_s15  ;;  %s290_s15 = scalar_lea.vmem %s192_s14, 128 }
  0x3f   :  { %v87_v10 = vadd.f32 %v86_v7, %v84_v6  ;;  %v94_v11 = vstv %s205_s16  ;;  %s211_s21 = sld [smem:[#allocation3 + $0x4]]  ;;  %p291_p6 = scmp.ne.s32.totalorder %s192_s14, %s290_s15 }
  0x40   :  { %v95_v13 = vmul.f32 %v94_v11, %v365_v0  ;;  %v97_v14 = vstv %s206_s4  ;;  %s212_s22 = sld [smem:[#allocation7 + $0x4]]  ;;  %v80_v15 = vmul.f32 %v79_v9, %v77_v8  ;;  %p295_p7 = scmp.lt.s32.totalorder %s192_s14, %s192_s14 }
  0x41   :  { %v88_v16 = vmax.f32 %v87_v10, 0.0  ;;  %s374_s23 = sld [smem:[#allocation9 + $0x4]]  ;;  %v101_v20 = vstv %s368_s17  ;;  %p296_p8 = scmp.lt.s32.totalorder %s290_s15, %s290_s15 }
  0x42   :  { %v98_v17 = vadd.f32 %v97_v14, %v95_v13  ;;  %v105_v18 = vstv %s208_s18  ;;  %s214_s24 = sld [smem:[#allocation3 + $0x5]] }
  0x43   :  { %v91_v19 = vmul.f32 %v90_v12, %v88_v16  ;;  %v106_v21 = vmul.f32 %v105_v18, %v365_v0  ;;  %v108_v22 = vstv %s209_s19  ;;  %s215_s25 = sld [smem:[#allocation7 + $0x5]]  ;;  %v182_v16 = vstv %s404_s3  ;;  %p297_p9 = por %p296_p8, %p295_p7 }
  0x44   :  { %v99_v23 = vmax.f32 %v98_v17, 0.0  ;;  %s378_s26 = sld [smem:[#allocation9 + $0x5]]  ;;  %v112_v28 = vstv %s371_s20 }
  0x45   :  { %v92_v24 = vadd.f32 %v91_v19, %v80_v15  ;;  %v109_v25 = vadd.f32 %v108_v22, %v106_v21  ;;  %v116_v26 = vstv %s211_s21  ;;  %s217_s1 = sld [smem:[#allocation3 + $0x6]]  ;;  %p298_p10 = pnand %p297_p9, %p291_p6 }
  0x46   :  { %v102_v27 = vmul.f32 %v101_v20, %v99_v23  ;;  %v117_v29 = vmul.f32 %v116_v26, %v365_v0  ;;  %v119_v30 = vstv %s212_s22  ;;  %s218_s0 = sld [smem:[#allocation7 + $0x6]] }
  0x47   :  { %v110_v31 = vmax.f32 %v109_v25, 0.0  ;;  %s382_s27 = sld [smem:[#allocation9 + $0x6]]  ;;  %v123_v36 = vstv %s374_s23 }
  0x48   :  { %v103_v32 = vadd.f32 %v102_v27, %v92_v24  ;;  %v120_v33 = vadd.f32 %v119_v30, %v117_v29  ;;  %v127_v34 = vstv %s214_s24  ;;  %s220_s28 = sld [smem:[#allocation3 + $0x7]] }
  0x49   :  { %v113_v35 = vmul.f32 %v112_v28, %v110_v31  ;;  %v128_v37 = vmul.f32 %v127_v34, %v365_v0  ;;  %v130_v38 = vstv %s215_s25  ;;  %s221_s29 = sld [smem:[#allocation7 + $0x7]] }
  0x4a   :  { %v121_v39 = vmax.f32 %v120_v33, 0.0  ;;  %s386_s30 = sld [smem:[#allocation9 + $0x7]]  ;;  %v134_v44 = vstv %s378_s26 }
  0x4b   :  { %v114_v40 = vadd.f32 %v113_v35, %v103_v32  ;;  %v131_v41 = vadd.f32 %v130_v38, %v128_v37  ;;  %v138_v42 = vstv %s217_s1  ;;  %s223_s6 = sld [smem:[#allocation3 + $0x8]] }
  0x4c   :  { %v124_v43 = vmul.f32 %v123_v36, %v121_v39  ;;  %v139_v45 = vmul.f32 %v138_v42, %v365_v0  ;;  %v141_v46 = vstv %s218_s0  ;;  %s224_s7 = sld [smem:[#allocation7 + $0x8]] }
  0x4d   :  { %v132_v47 = vmax.f32 %v131_v41, 0.0  ;;  %s225_s8 = sld [smem:[#allocation9 + $0x8]]  ;;  %v145_v52 = vstv %s382_s27 }
  0x4e   :  { %v125_v48 = vadd.f32 %v124_v43, %v114_v40  ;;  %v142_v49 = vadd.f32 %v141_v46, %v139_v45  ;;  %v149_v50 = vstv %s220_s28  ;;  %s226_s2 = sld [smem:[#allocation3 + $0x9]] }
  0x4f   :  { %v135_v51 = vmul.f32 %v134_v44, %v132_v47  ;;  %v150_v53 = vmul.f32 %v149_v50, %v365_v0  ;;  %v152_v54 = vstv %s221_s29  ;;  %s227_s9 = sld [smem:[#allocation7 + $0x9]] }
  0x50   :  { %v143_v55 = vmax.f32 %v142_v49, 0.0  ;;  %s228_s10 = sld [smem:[#allocation9 + $0x9]]  ;;  %v156_v60 = vstv %s386_s30 }
  0x51   :  { %v136_v56 = vadd.f32 %v135_v51, %v125_v48  ;;  %v153_v57 = vadd.f32 %v152_v54, %v150_v53  ;;  %v160_v58 = vstv %s223_s6 }
  0x52   :  { %v146_v59 = vmul.f32 %v145_v52, %v143_v55  ;;  %v161_v61 = vmul.f32 %v160_v58, %v365_v0  ;;  %v163_v62 = vstv %s224_s7 }
  0x53   :  { %v154_v63 = vmax.f32 %v153_v57, 0.0  ;;  %v167_v5 = vstv %s225_s8 }
  0x54   :  { %v147_v1 = vadd.f32 %v146_v59, %v136_v56  ;;  %v164_v2 = vadd.f32 %v163_v62, %v161_v61  ;;  %v171_v3 = vstv %s226_s2 }
  0x55   :  { %v157_v4 = vmul.f32 %v156_v60, %v154_v63  ;;  %v172_v6 = vmul.f32 %v171_v3, %v365_v0  ;;  %v174_v7 = vstv %s227_s9 }
  0x56   :  { %v165_v8 = vmax.f32 %v164_v2, 0.0  ;;  %v178_v12 = vstv %s228_s10 }
  0x57   :  { %v158_v9 = vadd.f32 %v157_v4, %v147_v1  ;;  %v175_v10 = vadd.f32 %v174_v7, %v172_v6 }
  0x58   :  { %v168_v11 = vmul.f32 %v167_v5, %v165_v8 }
  0x59   :  { %v176_v13 = vmax.f32 %v175_v10, 0.0 }
  0x5a   :  { %v169_v14 = vadd.f32 %v168_v11, %v158_v9 }
  0x5b   :  { %v179_v15 = vmul.f32 %v178_v12, %v176_v13 }
  0x5d   :  { %v180_v17 = vadd.f32 %v179_v15, %v169_v14 }
  0x5f   :  { %v183_v18 = vadd.f32 %v182_v16, %v180_v17 }
  0x61   :  { %184 = vst [vmem:[#allocation11] sm:$0xff] %v183_v18 }
  0x62   :  { %301 = shalt.err (!%p298_p10)
}
  0x63   :  { %194 = dma.vmem_to_hbm [thread:$0]  %s192_s14, 128, %s406_s5, [#allocation5]  }
  0x64   :  { %316 = dma.done.wait [#allocation5], 128  }
  0x65   :  { %317 = vsyncadd [#allocation5], 4294967168 }
  0x66   :  { %198 = vsyncpa [#allocation4], 1 }
  0x67   :  { %199 = vsyncpa [#allocation5], 1 }
  0x68   :  { %200 = vsyncpa [#allocation6], 1 }
  0x69   :  { %201 = vsyncpa [#allocation8], 1 }

</bundles_post_ra>
